<compile_context>
chip_gen: v7x
topology: tpu7x:2x2x1
jax: 0.10.0
libtpu: 0.0.40
codegen_flags: <defaults>
</compile_context>

<pallas_src>
import functools
import math

import jax
import jax.numpy as jnp
from jax.experimental import pallas as pl
from jax.experimental.pallas import tpu as pltpu


# ---------------------------------------------------------------------------
# Stage 1: convolution (single big-contraction matmul) + partial BN statistics
# ---------------------------------------------------------------------------
def _conv_stats_kernel(x_ref, w_ref, m_ref, y_ref, s1_ref, s2_ref, cols_ref,
                       *, H, W, Cin, K):
    """One batch element per grid step.

    x_ref   : (1, Cin, H*W + 2*halo)  flat image with 1-D zero halo (lane dense)
    w_ref   : (Cout, K*K*Cin)         weight, columns ordered (kh, kw, ci)
    m_ref   : (K, H*W)                horizontal validity mask per kw tap
    y_ref   : (1, Cout, H*W)          conv output (pre-BN), f32, lane dense
    s1_ref  : (1, Cout, 1)            partial per-channel sum
    s2_ref  : (1, Cout, 1)            partial per-channel sum of squares
    cols_ref: (K*K*Cin, H*W)          VMEM scratch: transposed im2col operand
    """
    HW = H * W
    p = (K - 1) // 2
    x = x_ref[0]            # (Cin, HW + 2*halo)
    masks = m_ref[...]      # (K, HW)

    # Assemble im2col^T once: each tap is a constant lane offset into the
    # halo-padded flat image.  Vertical OOB reads land in the zero halo; only
    # the off-center kw taps need the horizontal mask.
    for kh in range(K):
        for kw in range(K):
            off = kh * W + kw
            piece = x[:, off:off + HW]                       # (Cin, HW)
            if kw != p:
                piece = piece * masks[kw:kw + 1, :]
            cols_ref[pl.ds((kh * K + kw) * Cin, Cin), :] = piece

    # One MXU matmul: contraction = K*K*Cin, output lanes = H*W (lane dense).
    # Operands stay in their native dtype; accumulation is f32.
    y = jnp.dot(w_ref[...], cols_ref[...], preferred_element_type=jnp.float32)

    y_ref[0] = y
    # Fused partial BatchNorm statistics (combined globally outside the grid).
    s1_ref[0] = jnp.sum(y, axis=1, keepdims=True)
    s2_ref[0] = jnp.sum(y * y, axis=1, keepdims=True)


# ---------------------------------------------------------------------------
# Stage 2: y * scale + shift (single per-channel FMA), then ReLU
# ---------------------------------------------------------------------------
def _bn_relu_kernel(y_ref, scale_ref, shift_ref, o_ref):
    y = y_ref[0]                                    # (Cout, H*W) f32
    z = y * scale_ref[...] + shift_ref[...]         # (Cout,1) broadcast on lanes
    o_ref[0] = jnp.maximum(z, 0.0).astype(o_ref.dtype)


# ---------------------------------------------------------------------------
# Wrapper: NCHW in / NCHW out (matches the PyTorch module).  No activation
# transposes are needed: the channel-major flat layout used by the kernels is
# a pure (free) reshape of NCHW in HBM.
# ---------------------------------------------------------------------------
def cnn_bn_relu(x_nchw, weight_oihw, gamma, beta, *, eps=1e-5):
    N, Cin, H, W = x_nchw.shape
    Cout, Cin2, K, K2 = weight_oihw.shape
    assert Cin == Cin2 and K == K2
    assert K % 2 == 1, "padding=(K-1)//2 is only 'same' for odd filter sizes"
    assert Cout == Cin, "BatchNorm2d(in_channels) requires in_channels == out_channels"

    p = (K - 1) // 2
    HW = H * W
    halo = p * W + p
    KKC = K * K * Cin
    dtype = x_nchw.dtype
    itemsize = jnp.dtype(dtype).itemsize

    # --- cheap prep (free reshape + one small 1-D pad; weight/mask are tiny) --
    x_flat = x_nchw.reshape(N, Cin, HW)
    x_halo = jnp.pad(x_flat, ((0, 0), (0, 0), (halo, halo)))
    # TODO(synk): fold the 1-D halo pad into the kernel (masked loads) so the
    # activation is read from HBM exactly once per layer in a full DnCNN stack.

    # weight (Cout, Cin, K, K) -> (Cout, K*K*Cin), column order (kh, kw, ci).
    w2dT = jnp.transpose(weight_oihw, (0, 2, 3, 1)).reshape(Cout, KKC).astype(dtype)

    # Horizontal validity mask per kw tap: valid iff 0 <= w + kw - p < W.
    w_of_j = jnp.arange(HW, dtype=jnp.int32) % W
    masks = jnp.stack(
        [((w_of_j + kw - p >= 0) & (w_of_j + kw - p < W)) for kw in range(K)]
    ).astype(dtype)                                             # (K, HW)

    # ------------------------- stage 1: conv + stats -------------------------
    conv_kernel = functools.partial(_conv_stats_kernel, H=H, W=W, Cin=Cin, K=K)
    flops1 = 2 * N * Cout * KKC * HW
    bytes1 = (x_halo.size + w2dT.size + masks.size) * itemsize \
        + (N * Cout * HW + 2 * N * Cout) * 4
    y, s1, s2 = pl.pallas_call(
        conv_kernel,
        grid=(N,),
        in_specs=[
            pl.BlockSpec((1, Cin, HW + 2 * halo), lambda n: (n, 0, 0)),
            pl.BlockSpec((Cout, KKC), lambda n: (0, 0)),
            pl.BlockSpec((K, HW), lambda n: (0, 0)),
        ],
        out_specs=[
            pl.BlockSpec((1, Cout, HW), lambda n: (n, 0, 0)),
            pl.BlockSpec((1, Cout, 1), lambda n: (n, 0, 0)),
            pl.BlockSpec((1, Cout, 1), lambda n: (n, 0, 0)),
        ],
        out_shape=[
            jax.ShapeDtypeStruct((N, Cout, HW), jnp.float32),
            jax.ShapeDtypeStruct((N, Cout, 1), jnp.float32),
            jax.ShapeDtypeStruct((N, Cout, 1), jnp.float32),
        ],
        scratch_shapes=[pltpu.VMEM((KKC, HW), dtype)],
        compiler_params=pltpu.CompilerParams(
            dimension_semantics=("parallel",),          # megacore split on v7x
            vmem_limit_bytes=32 * 1024 * 1024,          # fits every generation
        ),
        cost_estimate=pl.CostEstimate(
            flops=flops1, transcendentals=0, bytes_accessed=bytes1),
    )(x_halo, w2dT, masks)

    # ---- tiny global-stat combine: BN mean/var stay global over (N, H, W) ---
    count = N * HW
    mean = jnp.sum(s1, axis=(0, 2)) / count                     # (Cout,)
    var = jnp.maximum(jnp.sum(s2, axis=(0, 2)) / count - mean * mean, 0.0)
    scale = (gamma.astype(jnp.float32) * jax.lax.rsqrt(var + eps)).reshape(Cout, 1)
    shift = beta.astype(jnp.float32).reshape(Cout, 1) - mean.reshape(Cout, 1) * scale
    # (Cout,1) params in VMEM pad to one (8,128) tile each -- accepted consciously.

    # ----------------------- stage 2: normalize + ReLU -----------------------
    bytes2 = N * Cout * HW * 4 + N * Cout * HW * itemsize
    out_flat = pl.pallas_call(
        _bn_relu_kernel,
        grid=(N,),
        in_specs=[
            pl.BlockSpec((1, Cout, HW), lambda n: (n, 0, 0)),
            pl.BlockSpec((Cout, 1), lambda n: (0, 0)),
            pl.BlockSpec((Cout, 1), lambda n: (0, 0)),
        ],
        out_specs=pl.BlockSpec((1, Cout, HW), lambda n: (n, 0, 0)),
        out_shape=jax.ShapeDtypeStruct((N, Cout, HW), dtype),
        compiler_params=pltpu.CompilerParams(
            dimension_semantics=("parallel",),
            vmem_limit_bytes=32 * 1024 * 1024,
        ),
        cost_estimate=pl.CostEstimate(
            flops=2 * N * Cout * HW, transcendentals=0, bytes_accessed=bytes2),
    )(y, scale, shift)

    return out_flat.reshape(N, Cout, H, W)                      # NCHW, free reshape


if __name__ == "__main__":
    key = jax.random.PRNGKey(0)
    N, C, H, W, K = 2, 4, 16, 16, 3     # in_channels = out_channels = 4, 3x3 filter
    p = (K - 1) // 2

    k_x, k_w = jax.random.split(key)
    x = jax.random.normal(k_x, (N, C, H, W), dtype=jnp.float32)

    # Deterministic Conv2d weight (PyTorch-style uniform bound, bias=False).
    fan_in = C * K * K
    bound = 1.0 / math.sqrt(fan_in)
    conv_w = jax.random.uniform(k_w, (C, C, K, K), jnp.float32, -bound, bound)

    # BatchNorm2d affine params at default init.
    gamma = jnp.ones((C,), jnp.float32)
    beta = jnp.zeros((C,), jnp.float32)

    out = cnn_bn_relu(x, conv_w, gamma, beta)
    jax.block_until_ready(out)
    assert out.shape == (N, C, H, W)

    # Pure-JAX reference: Conv2d('same', no bias) -> train-mode BN -> ReLU.
    conv_ref = jax.lax.conv_general_dilated(
        x, conv_w, window_strides=(1, 1), padding=((p, p), (p, p)),
        dimension_numbers=("NCHW", "OIHW", "NCHW"),
        precision=jax.lax.Precision.HIGHEST)
    mu = conv_ref.mean(axis=(0, 2, 3), keepdims=True)
    vr = ((conv_ref - mu) ** 2).mean(axis=(0, 2, 3), keepdims=True)
    ref = jnp.maximum(
        (conv_ref - mu) * jax.lax.rsqrt(vr + 1e-5)
        * gamma.reshape(1, C, 1, 1) + beta.reshape(1, C, 1, 1), 0.0)
    err = float(jnp.max(jnp.abs(out - ref)))
    assert jnp.allclose(out, ref, atol=2e-2, rtol=2e-2), f"max abs err {err}"

    print("KERNEL_OK")
</pallas_src>

<mosaic_0001>
module attributes {stable_mosaic.version = 11 : i64} {
  func.func @_conv_stats_kernel(%arg0: i32, %arg1: memref<1x4x290xf32, #tpu.memory_space<vmem>>, %arg2: memref<4x36xf32, #tpu.memory_space<vmem>>, %arg3: memref<3x256xf32, #tpu.memory_space<vmem>>, %arg4: memref<1x4x256xf32, #tpu.memory_space<vmem>>, %arg5: memref<1x4x1xf32, #tpu.memory_space<vmem>>, %arg6: memref<1x4x1xf32, #tpu.memory_space<vmem>>, %arg7: memref<36x256xf32, #tpu.memory_space<vmem>>) attributes {dimension_semantics = [#tpu.dimension_semantics<parallel>], iteration_bounds = array<i64: 2>, scalar_prefetch = 0 : i64, scratch_operands = 1 : i64, tpu.core_type = #tpu.core_type<tc>, window_params = [{transform_indices = @transform_0, window_bounds = array<i64: 1, 4, 290>}, {pipeline_mode = #tpu.pipeline_mode<synchronous>, transform_indices = @transform_1, window_bounds = array<i64: 4, 36>}, {pipeline_mode = #tpu.pipeline_mode<synchronous>, transform_indices = @transform_2, window_bounds = array<i64: 3, 256>}, {transform_indices = @transform_3, window_bounds = array<i64: 1, 4, 256>}, {transform_indices = @transform_4, window_bounds = array<i64: 1, 4, 1>}, {transform_indices = @transform_5, window_bounds = array<i64: 1, 4, 1>}]} {
    %c0 = arith.constant 0 : index
    %c0_0 = arith.constant 0 : index
    %c0_1 = arith.constant 0 : index
    %0 = vector.load %arg1[%c0, %c0_0, %c0_1] : memref<1x4x290xf32, #tpu.memory_space<vmem>>, vector<1x4x290xf32>
    %1 = vector.shape_cast %0 : vector<1x4x290xf32> to vector<4x290xf32>
    %c0_2 = arith.constant 0 : index
    %c0_3 = arith.constant 0 : index
    %2 = vector.load %arg3[%c0_2, %c0_3] : memref<3x256xf32, #tpu.memory_space<vmem>>, vector<3x256xf32>
    %3 = vector.extract_strided_slice %1 {offsets = [0, 0], sizes = [4, 256], strides = [1, 1]} : vector<4x290xf32> to vector<4x256xf32>
    %4 = vector.extract_strided_slice %2 {offsets = [0, 0], sizes = [1, 256], strides = [1, 1]} : vector<3x256xf32> to vector<1x256xf32>
    %5 = vector.broadcast %4 : vector<1x256xf32> to vector<4x256xf32>
    %6 = arith.mulf %3, %5 : vector<4x256xf32>
    %c0_4 = arith.constant 0 : index
    %c0_5 = arith.constant 0 : index
    %7 = vector.load %arg7[%c0_4, %c0_5] : memref<36x256xf32, #tpu.memory_space<vmem>>, vector<4x256xf32>
    tpu.vector_store %arg7[%c0_4, %c0_5], %6 {strides = array<i32>} : memref<36x256xf32, #tpu.memory_space<vmem>>, vector<4x256xf32>,
    %8 = vector.extract_strided_slice %1 {offsets = [0, 1], sizes = [4, 256], strides = [1, 1]} : vector<4x290xf32> to vector<4x256xf32>
    %c4 = arith.constant 4 : index
    %c0_6 = arith.constant 0 : index
    %9 = vector.load %arg7[%c4, %c0_6] : memref<36x256xf32, #tpu.memory_space<vmem>>, vector<4x256xf32>
    tpu.vector_store %arg7[%c4, %c0_6], %8 {strides = array<i32>} : memref<36x256xf32, #tpu.memory_space<vmem>>, vector<4x256xf32>,
    %10 = vector.extract_strided_slice %1 {offsets = [0, 2], sizes = [4, 256], strides = [1, 1]} : vector<4x290xf32> to vector<4x256xf32>
    %11 = vector.extract_strided_slice %2 {offsets = [2, 0], sizes = [1, 256], strides = [1, 1]} : vector<3x256xf32> to vector<1x256xf32>
    %12 = vector.broadcast %11 : vector<1x256xf32> to vector<4x256xf32>
    %13 = arith.mulf %10, %12 : vector<4x256xf32>
    %c8 = arith.constant 8 : index
    %c0_7 = arith.constant 0 : index
    %14 = vector.load %arg7[%c8, %c0_7] : memref<36x256xf32, #tpu.memory_space<vmem>>, vector<4x256xf32>
    tpu.vector_store %arg7[%c8, %c0_7], %13 {strides = array<i32>} : memref<36x256xf32, #tpu.memory_space<vmem>>, vector<4x256xf32>,
    %15 = vector.extract_strided_slice %1 {offsets = [0, 16], sizes = [4, 256], strides = [1, 1]} : vector<4x290xf32> to vector<4x256xf32>
    %16 = vector.extract_strided_slice %2 {offsets = [0, 0], sizes = [1, 256], strides = [1, 1]} : vector<3x256xf32> to vector<1x256xf32>
    %17 = vector.broadcast %16 : vector<1x256xf32> to vector<4x256xf32>
    %18 = arith.mulf %15, %17 : vector<4x256xf32>
    %c12 = arith.constant 12 : index
    %c0_8 = arith.constant 0 : index
    %19 = vector.load %arg7[%c12, %c0_8] : memref<36x256xf32, #tpu.memory_space<vmem>>, vector<4x256xf32>
    tpu.vector_store %arg7[%c12, %c0_8], %18 {strides = array<i32>} : memref<36x256xf32, #tpu.memory_space<vmem>>, vector<4x256xf32>,
    %20 = vector.extract_strided_slice %1 {offsets = [0, 17], sizes = [4, 256], strides = [1, 1]} : vector<4x290xf32> to vector<4x256xf32>
    %c16 = arith.constant 16 : index
    %c0_9 = arith.constant 0 : index
    %21 = vector.load %arg7[%c16, %c0_9] : memref<36x256xf32, #tpu.memory_space<vmem>>, vector<4x256xf32>
    tpu.vector_store %arg7[%c16, %c0_9], %20 {strides = array<i32>} : memref<36x256xf32, #tpu.memory_space<vmem>>, vector<4x256xf32>,
    %22 = vector.extract_strided_slice %1 {offsets = [0, 18], sizes = [4, 256], strides = [1, 1]} : vector<4x290xf32> to vector<4x256xf32>
    %23 = vector.extract_strided_slice %2 {offsets = [2, 0], sizes = [1, 256], strides = [1, 1]} : vector<3x256xf32> to vector<1x256xf32>
    %24 = vector.broadcast %23 : vector<1x256xf32> to vector<4x256xf32>
    %25 = arith.mulf %22, %24 : vector<4x256xf32>
    %c20 = arith.constant 20 : index
    %c0_10 = arith.constant 0 : index
    %26 = vector.load %arg7[%c20, %c0_10] : memref<36x256xf32, #tpu.memory_space<vmem>>, vector<4x256xf32>
    tpu.vector_store %arg7[%c20, %c0_10], %25 {strides = array<i32>} : memref<36x256xf32, #tpu.memory_space<vmem>>, vector<4x256xf32>,
    %27 = vector.extract_strided_slice %1 {offsets = [0, 32], sizes = [4, 256], strides = [1, 1]} : vector<4x290xf32> to vector<4x256xf32>
    %28 = vector.extract_strided_slice %2 {offsets = [0, 0], sizes = [1, 256], strides = [1, 1]} : vector<3x256xf32> to vector<1x256xf32>
    %29 = vector.broadcast %28 : vector<1x256xf32> to vector<4x256xf32>
    %30 = arith.mulf %27, %29 : vector<4x256xf32>
    %c24 = arith.constant 24 : index
    %c0_11 = arith.constant 0 : index
    %31 = vector.load %arg7[%c24, %c0_11] : memref<36x256xf32, #tpu.memory_space<vmem>>, vector<4x256xf32>
    tpu.vector_store %arg7[%c24, %c0_11], %30 {strides = array<i32>} : memref<36x256xf32, #tpu.memory_space<vmem>>, vector<4x256xf32>,
    %32 = vector.extract_strided_slice %1 {offsets = [0, 33], sizes = [4, 256], strides = [1, 1]} : vector<4x290xf32> to vector<4x256xf32>
    %c28 = arith.constant 28 : index
    %c0_12 = arith.constant 0 : index
    %33 = vector.load %arg7[%c28, %c0_12] : memref<36x256xf32, #tpu.memory_space<vmem>>, vector<4x256xf32>
    tpu.vector_store %arg7[%c28, %c0_12], %32 {strides = array<i32>} : memref<36x256xf32, #tpu.memory_space<vmem>>, vector<4x256xf32>,
    %34 = vector.extract_strided_slice %1 {offsets = [0, 34], sizes = [4, 256], strides = [1, 1]} : vector<4x290xf32> to vector<4x256xf32>
    %35 = vector.extract_strided_slice %2 {offsets = [2, 0], sizes = [1, 256], strides = [1, 1]} : vector<3x256xf32> to vector<1x256xf32>
    %36 = vector.broadcast %35 : vector<1x256xf32> to vector<4x256xf32>
    %37 = arith.mulf %34, %36 : vector<4x256xf32>
    %c32 = arith.constant 32 : index
    %c0_13 = arith.constant 0 : index
    %38 = vector.load %arg7[%c32, %c0_13] : memref<36x256xf32, #tpu.memory_space<vmem>>, vector<4x256xf32>
    tpu.vector_store %arg7[%c32, %c0_13], %37 {strides = array<i32>} : memref<36x256xf32, #tpu.memory_space<vmem>>, vector<4x256xf32>,
    %c0_14 = arith.constant 0 : index
    %c0_15 = arith.constant 0 : index
    %39 = vector.load %arg2[%c0_14, %c0_15] : memref<4x36xf32, #tpu.memory_space<vmem>>, vector<4x36xf32>
    %c0_16 = arith.constant 0 : index
    %c0_17 = arith.constant 0 : index
    %40 = vector.load %arg7[%c0_16, %c0_17] : memref<36x256xf32, #tpu.memory_space<vmem>>, vector<36x256xf32>
    %cst = arith.constant dense<0.000000e+00> : vector<4x256xf32>
    %41 = tpu.matmul %39, %40, %cst {dimension_numbers = #tpu.dot_dimension_numbers<[1], [0], [0], [1], [0, 0, 1, 1], [], []>} : vector<4x36xf32>, vector<36x256xf32>, vector<4x256xf32> -> vector<4x256xf32>
    %c0_18 = arith.constant 0 : index
    %c0_19 = arith.constant 0 : index
    %c0_20 = arith.constant 0 : index
    %42 = vector.load %arg4[%c0_18, %c0_19, %c0_20] : memref<1x4x256xf32, #tpu.memory_space<vmem>>, vector<1x4x256xf32>
    %43 = vector.shape_cast %42 : vector<1x4x256xf32> to vector<4x256xf32>
    %44 = vector.shape_cast %41 : vector<4x256xf32> to vector<1x4x256xf32>
    tpu.vector_store %arg4[%c0_18, %c0_19, %c0_20], %44 {strides = array<i32>} : memref<1x4x256xf32, #tpu.memory_space<vmem>>, vector<1x4x256xf32>,
    %cst_21 = arith.constant dense<0.000000e+00> : vector<4xf32>
    %45 = vector.multi_reduction <add>, %41, %cst_21 [1] : vector<4x256xf32> to vector<4xf32>
    %46 = vector.shape_cast %45 : vector<4xf32> to vector<4x1xf32>
    %c0_22 = arith.constant 0 : index
    %c0_23 = arith.constant 0 : index
    %c0_24 = arith.constant 0 : index
    %47 = vector.load %arg5[%c0_22, %c0_23, %c0_24] : memref<1x4x1xf32, #tpu.memory_space<vmem>>, vector<1x4x1xf32>
    %48 = vector.shape_cast %47 : vector<1x4x1xf32> to vector<4x1xf32>
    %49 = vector.shape_cast %46 : vector<4x1xf32> to vector<1x4x1xf32>
    tpu.vector_store %arg5[%c0_22, %c0_23, %c0_24], %49 {strides = array<i32>} : memref<1x4x1xf32, #tpu.memory_space<vmem>>, vector<1x4x1xf32>,
    %50 = arith.mulf %41, %41 : vector<4x256xf32>
    %cst_25 = arith.constant dense<0.000000e+00> : vector<4xf32>
    %51 = vector.multi_reduction <add>, %50, %cst_25 [1] : vector<4x256xf32> to vector<4xf32>
    %52 = vector.shape_cast %51 : vector<4xf32> to vector<4x1xf32>
    %c0_26 = arith.constant 0 : index
    %c0_27 = arith.constant 0 : index
    %c0_28 = arith.constant 0 : index
    %53 = vector.load %arg6[%c0_26, %c0_27, %c0_28] : memref<1x4x1xf32, #tpu.memory_space<vmem>>, vector<1x4x1xf32>
    %54 = vector.shape_cast %53 : vector<1x4x1xf32> to vector<4x1xf32>
    %55 = vector.shape_cast %52 : vector<4x1xf32> to vector<1x4x1xf32>
    tpu.vector_store %arg6[%c0_26, %c0_27, %c0_28], %55 {strides = array<i32>} : memref<1x4x1xf32, #tpu.memory_space<vmem>>, vector<1x4x1xf32>,
    return
  }
  func.func @transform_0(%arg0: i32) -> (i32, i32, i32) {
    %c0_i32 = arith.constant 0 : i32
    %c0_i32_0 = arith.constant 0 : i32
    %c0_i32_1 = arith.constant 0 : i32
    return %arg0, %c0_i32, %c0_i32_0 : i32, i32, i32
  }
  func.func @transform_1(%arg0: i32) -> (i32, i32) {
    %c0_i32 = arith.constant 0 : i32
    %c0_i32_0 = arith.constant 0 : i32
    %c0_i32_1 = arith.constant 0 : i32
    return %c0_i32, %c0_i32_0 : i32, i32
  }
  func.func @transform_2(%arg0: i32) -> (i32, i32) {
    %c0_i32 = arith.constant 0 : i32
    %c0_i32_0 = arith.constant 0 : i32
    %c0_i32_1 = arith.constant 0 : i32
    return %c0_i32, %c0_i32_0 : i32, i32
  }
  func.func @transform_3(%arg0: i32) -> (i32, i32, i32) {
    %c0_i32 = arith.constant 0 : i32
    %c0_i32_0 = arith.constant 0 : i32
    %c0_i32_1 = arith.constant 0 : i32
    return %arg0, %c0_i32, %c0_i32_0 : i32, i32, i32
  }
  func.func @transform_4(%arg0: i32) -> (i32, i32, i32) {
    %c0_i32 = arith.constant 0 : i32
    %c0_i32_0 = arith.constant 0 : i32
    %c0_i32_1 = arith.constant 0 : i32
    return %arg0, %c0_i32, %c0_i32_0 : i32, i32, i32
  }
  func.func @transform_5(%arg0: i32) -> (i32, i32, i32) {
    %c0_i32 = arith.constant 0 : i32
    %c0_i32_0 = arith.constant 0 : i32
    %c0_i32_1 = arith.constant 0 : i32
    return %arg0, %c0_i32, %c0_i32_0 : i32, i32, i32
  }
}

</mosaic_0001>

<bundles_post_ra>
// kernel: tpu_custom_call.1
= control target key start
LH: loop header
LB: loop body
LE: loop exit
PB: predicated region body
PF: predicated region fallthrough
CT: control target
= control target key end

     0   :  { %11 = vsyncpa [#allocation4], 0  ;;  %s1400_s0 = inlined_call_operand.hbm [shape: f32[2,4,290], index: 0, kind: input, shape index: {}]   ;;  %s1401_s1 = inlined_call_operand.hbm [shape: f32[4,36], index: 1, kind: input, shape index: {}]   ;;  %s1402_s2 = inlined_call_operand.hbm [shape: f32[3,256], index: 2, kind: input, shape index: {}]   ;;  %s1403_s3 = inlined_call_operand.hbm [shape: f32[2,4,256], index: 3, kind: output, shape index: {0}]   ;;  %s1404_s4 = inlined_call_operand.vmem [shape: f32[2,4,1], index: 4, kind: output, shape index: {1}]   ;;  %s1405_s5 = inlined_call_operand.vmem [shape: f32[2,4,1], index: 5, kind: output, shape index: {2}]  }
   0x1   :  { %13 = vsyncpa [#allocation4 + $0x1], 0 }
   0x2   :  { %14 = vsyncpa [#allocation7], 0 }
   0x3   :  { %15 = vsyncpa [#allocation5], 0 }
   0x4   :  { %17 = vsyncpa [#allocation5 + $0x1], 0  ;;  %s1112_s18 = smov 0   ;;  %s1114_s19 = smov 0  }
   0x5   :  { %s1116_s20 = smov 0   ;;  %s1118_s21 = smov 0  }
   0x6 LB: > { %s1133_s22 = sadd.s32 4294967295, %s1062_s21   ;;  %s790_s23 = sadd.s32 4294967294, %s1062_s21   ;;  %s1062_s21 = sphi %s1118_s21, %s1425_s21   ;;  %s1058_s20 = sphi %s1116_s20, %s1424_s20   ;;  %s1054_s19 = sphi %s1114_s19, %s1423_s19   ;;  %s1050_s18 = sphi %s1112_s18, %s1422_s18  }
   0x7   : > { %p43_p0 = scmp.ne.s32.totalorder %s1054_s19, %s1050_s18  ;;  %p1406_p1 = scmp.eq.s32.totalorder %s1133_s22, 0 }
   0x8   : > { %p115_p3 = scmp.eq.s32.totalorder %s790_s23, 1  ;;  %p791_p5 = scmp.ge.s32.totalorder %s1062_s21, 1 }
   0x9   : > { %p1142_p4 = por %p1406_p1, %p43_p0  ;;  %p174_p7 = scmp.lt.s32.totalorder %s1062_s21, 3 }
   0xa   : > { %p1147_p6 = por %p115_p3, %p43_p0  ;;  %s1064_s27 = smov [#allocation6]  }
   0xb   : > { %s1409_s24 = scalar_select %p1142_p4, 1, 0 }
   0xc   : > { %s1410_s25 = scalar_select %p1147_p6, 1, 0 }
   0xd   : > { %p1152_p8 = pnand %p791_p5, %p174_p7  ;;  %s187_s28 = sshll.u32 %s1064_s27, 4  ;;  %s188_s28 = int_to_ptr.vmem [resolvable:$true] %s187_s28 }
   0xe   : > { %s1065_s29 = smov [#allocation8]   ;;  %s1168_s7 = sadd.s32 1, %s1062_s21  }
   0xf   : > { %s1411_s26 = scalar_select %p1152_p8, 1, 0 }
  0x10   : > { %p834_p10 = pneg %p1152_p8  ;;  %s198_s30 = sshll.u32 %s1065_s29, 4  ;;  %s1165_s30 = int_to_ptr.vmem [resolvable:$true] %s198_s30 }
  0x11   : > { %s27_s8 = ssub.s32 %s1062_s21, %s1168_s7  ;;  %s906_s11 = scalar_lea.hbm %s1401_s1, 64 }
  0x12   : > { %p1161_p11 = pnand %p834_p10, %p1406_p1  ;;  %p907_p12 = scmp.ne.s32.totalorder %s1401_s1, %s906_s11 }
  0x13   : > { %p913_p5 = scmp.lt.u32.totalorder %s906_s11, %s1401_s1 }
  0x14   : > { %p908_p13 = pneg %p1161_p11 }
  0x16   : > { %p909_p0 = pnand %p908_p13, %p907_p12 }
  0x18   : > { %p910_p3 = pneg %p909_p0 }
  0x1a   : > { %p915_p7 = pnand %p913_p5, %p910_p3 }
  0x1c   : > { %918 = shalt.err (!%p915_p7)
}
  0x1d   : > { %s919_s16 = scalar_lea.vmem %s188_s28, 64  ;;  %p927_p2 = scmp.lt.s32.totalorder %s188_s28, %s188_s28 }
  0x1e   : > { %p920_p10 = scmp.ne.s32.totalorder %s188_s28, %s919_s16  ;;  %p928_p6 = scmp.lt.s32.totalorder %s919_s16, %s919_s16 }
  0x20   : > { %p922_p9 = pnand %p920_p10, %p908_p13  ;;  %p929_p4 = por %p928_p6, %p927_p2 }
  0x22   : > { %p923_p1 = pneg %p922_p9 }
  0x24   : > { %p930_p8 = pnand %p929_p4, %p923_p1 }
  0x26   : > { %933 = shalt.err (!%p930_p8)
}
  0x27   : > { %837 = dma.hbm_to_vmem [thread:$0]  (!%p1161_p11), %s1401_s1, 64, %s188_s28, [#allocation7]  }
  0x28   : > { %s934_s9 = scalar_lea.hbm %s1402_s2, 128 }
  0x29   : > { %p935_p9 = scmp.ne.s32.totalorder %s1402_s2, %s934_s9  ;;  %p941_p4 = scmp.lt.u32.totalorder %s934_s9, %s1402_s2 }
  0x2b   : > { %p937_p2 = pnand %p935_p9, %p908_p13 }
  0x2d   : > { %p938_p1 = pneg %p937_p2 }
  0x2f   : > { %p943_p6 = pnand %p941_p4, %p938_p1 }
  0x31   : > { %946 = shalt.err (!%p943_p6)
}
  0x32   : > { %s947_s28 = scalar_lea.vmem %s1165_s30, 128  ;;  %p955_p3 = scmp.lt.s32.totalorder %s1165_s30, %s1165_s30 }
  0x33   : > { %p948_p8 = scmp.ne.s32.totalorder %s1165_s30, %s947_s28  ;;  %p956_p5 = scmp.lt.s32.totalorder %s947_s28, %s947_s28 }
  0x35   : > { %p950_p12 = pnand %p948_p8, %p908_p13  ;;  %p957_p7 = por %p956_p5, %p955_p3 }
  0x37   : > { %p951_p0 = pneg %p950_p12 }
  0x39   : > { %p958_p10 = pnand %p957_p7, %p951_p0 }
  0x3b   : > { %961 = shalt.err (!%p958_p10)
}
  0x3c   : > { %840 = dma.hbm_to_vmem [thread:$0]  (!%p1161_p11), %s1402_s2, 128, %s1165_s30, [#allocation7]  }
  0x3d   : > { %p28_p13 = scmp.eq.s32.totalorder %s27_s8, 0  ;;  %s30_s16 = sadd.s32 1, %s1058_s20 }
  0x3e   : > { %p37_p9 = scmp.ne.s32.totalorder %s1058_s20, %s1054_s19  ;;  %p38_p2 = scmp.eq.s32.totalorder %s1062_s21, 0 }
  0x3f   : > { %s1227_s6 = scalar_select %p28_p13, %s1058_s20, %s30_s16  }
  0x40   : > { %p39_p1 = por %p38_p2, %p37_p9  ;;  %p1413_p4 = scmp.eq.s32.totalorder %s1133_s22, 1 }
  0x41   : > { %p851_p8 = scmp.lt.s32.totalorder %s1062_s21, 2  ;;  %s209_s23 = sand.u32 1, %s1058_s20  }
  0x42   : > { %p1231_p6 = por %p1413_p4, %p37_p9  ;;  %s819_s27 = smul.u32 12, %s209_s23 }
  0x43   : > { %s820_s29 = smul.u32 192, %s1062_s21  ;;  %p1238_p12 = pnand %p851_p8, %p39_p1 }
  0x44   : > { %s213_s11 = scalar_lea.vmem [#allocation3], %s819_s27  ;;  %s210_s13 = scalar_lea.sflag [#allocation4], %s209_s23 }
  0x45   : > { %s1245_s10 = scalar_lea.hbm %s1400_s0, %s820_s29  ;;  %s221_s12 = sshll.u32 %s213_s11, 4  ;;  %s1247_s12 = int_to_ptr.vmem [resolvable:$true] %s221_s12 }
  0x46   : > { %s962_s28 = scalar_lea.hbm %s1245_s10, 192  ;;  %p964_p0 = pneg %p1238_p12 }
  0x47   : > { %p963_p11 = scmp.ne.s32.totalorder %s1245_s10, %s962_s28  ;;  %s967_s16 = scalar_lea.hbm %s1400_s0, 384 }
  0x48   : > { %p968_p7 = scmp.lt.u32.totalorder %s1245_s10, %s1400_s0  ;;  %p969_p10 = scmp.lt.u32.totalorder %s967_s16, %s962_s28 }
  0x49   : > { %p965_p3 = pnand %p964_p0, %p963_p11  ;;  %p971_p9 = scmp.lt.u32.totalorder %s962_s28, %s1245_s10 }
  0x4a   : > { %p970_p13 = por %p969_p10, %p968_p7 }
  0x4b   : > { %p966_p5 = pneg %p965_p3 }
  0x4c   : > { %p972_p2 = por %p971_p9, %p970_p13 }
  0x4e   : > { %p973_p1 = pnand %p972_p2, %p966_p5 }
  0x50   : > { %976 = shalt.err (!%p973_p1)
}
  0x51   : > { %s977_s23 = scalar_lea.vmem %s1247_s12, 192  ;;  %s1066_s27 = smov [#allocation3]  }
  0x52   : > { %p978_p4 = scmp.ne.s32.totalorder %s1247_s12, %s977_s23  ;;  %s982_s8 = sshll.u32 %s1066_s27, 4  ;;  %s983_s8 = int_to_ptr.vmem [resolvable:$false] %s982_s8 }
  0x53   : > { %s984_s11 = scalar_lea.vmem %s983_s8, 384  ;;  %p985_p3 = scmp.lt.s32.totalorder %s1247_s12, %s983_s8 }
  0x54   : > { %p980_p8 = pnand %p978_p4, %p964_p0  ;;  %p986_p7 = scmp.lt.s32.totalorder %s984_s11, %s977_s23 }
  0x56   : > { %p981_p11 = pneg %p980_p8  ;;  %p987_p10 = por %p986_p7, %p985_p3 }
  0x58   : > { %p988_p13 = pnand %p987_p10, %p981_p11 }
  0x5a   : > { %991 = shalt.err (!%p988_p13)
}
  0x5b   : > { %844 = dma.hbm_to_vmem [thread:$0]  (!%p1238_p12), %s1245_s10, 192, %s1247_s12, %s210_s13  }
  0x5c   : > { %p1416_p5 = scmp.ne.s32.totalorder %s1411_s26, 0 }
  0x5d   : > { %s1277_s28 = sand.u32 (!%p1416_p5), 1, %s1054_s19   ;;  %p1417_p0 = scmp.ne.s32.totalorder (!%p1416_p5), %s1409_s24, 0 }
  0x5e   : > { %230 = sbr.rel (%p1416_p5) target bundleno = 753 (0x2f1), region = 32  ;;  %s233_s15 = scalar_lea.sflag (!%p1416_p5), [#allocation4], %s1277_s28 }
  0x5f   : > { %s821_s14 = smul.u32 (!%p1416_p5), 12, %s1277_s28 }
  0x61   : > { %s1281_s16 = scalar_lea.vmem (!%p1416_p5), [#allocation3], %s821_s14 }
  0x65   : > { %1037 = dma.done.wait (%p1417_p0), %s233_s15, 192  }
  0x66   : > { %1039 = vsyncadd (%p1417_p0), %s233_s15, 4294967104  ;;  %p1418_p12 = scmp.eq.s32.totalorder %s1133_s22, 0 }
  0x68   : > { %1041 = dma.done.wait (%p1418_p12), [#allocation7], 192   ;;  %p1419_p9 = pmov %p1418_p12 }
  0x69   : > { %v291_v0 = vlaneseq  ;;  %v289_v6 = vld [vmem:[#allocation8] sm:$0x77]  ;;  %s1067_s24 = smov 2   ;;  %s1068_s26 = smov 32   ;;  %v1296_v20 = vld [vmem:[%s1281_s16 + $0x8] sm:$0xf] }
  0x6a   : > { %1043 = vsyncadd (%p1419_p9), [#allocation7], 4294967104  ;;  %v1292_v17 = vld [vmem:[%s1281_s16] sm:$0xff]  ;;  %s1069_s9 = smov 16   ;;  %s1070_s10 = smov 18   ;;  %v322_v21 = vcombine.low %v1296_v20, %v1296_v20  ;;  %vm360_vm0 = vcmask 15360  }
  0x6b   : > { %v292_v1 = vshrl.u32 %v291_v0, 7  ;;  %s1071_s12 = smov 34   ;;  %s1072_s13 = smov 127   ;;  %v1303_v22 = vcombine.low %v1292_v17, %v1292_v17  ;;  %v408_v23 = vcombine.high %v1292_v17, %v1292_v17  ;;  %vm385_vm1 = vcmask 130048  }
  0x6c   : > { %s1073_s29 = smov 111   ;;  %s1074_s30 = smov 95   ;;  %vm425_vm2 = vcmask 146432   ;;  %vm451_vm3 = vcmask 261120   ;;  %vm329_vm4 = vcmask 1039360   ;;  %vm415_vm5 = vcmask 908288  }
  0x6d   : > { %v338_v2 = vsub.s32 2, %v292_v1  ;;  %v342_v3 = vsub.s32 6, %v292_v1  ;;  %v293_v4 = vsub.s32 0, %v292_v1  ;;  %v297_v5 = vsub.s32 4, %v292_v1  ;;  %s1075_s23 = smov 126   ;;  %s1076_s27 = smov 96  }
  0x6e   : > { %s1077_s8 = smov 112   ;;  %s1078_s11 = smov 110   ;;  %vm489_vm6 = vcmask 277504   ;;  %vm479_vm7 = vcmask 777216   ;;  %vm441_vm8 = vcmask 900096   ;;  %vm375_vm9 = vcmask 1031168  }
  0x6f   : > { %v339_v7 = vrot.slane %v289_v6, %v338_v2  ;;  %v343_v8 = vrot.slane %v289_v6, %v342_v3  ;;  %v294_v9 = vrot.slane %v289_v6, %v293_v4  ;;  %v298_v10 = vrot.slane %v289_v6, %v297_v5  ;;  %s1079_s14 = smov 94   ;;  %s799_s15 = sshll.u32 %s1277_s28, 3 }
  0x70   : > { %v1080_v5 = vmov 0.0   ;;  %vm401_vm10 = vcmask 916480   ;;  %vm466_vm11 = vcmask 785408   ;;  %vm504_vm12 = vcmask 769024   ;;  %s266_s16 = scalar_lea.vmem [#allocation9], %s799_s15 }
  0x71   : > { %v349_v11 = vrot.slane %v339_v7, %v338_v2  ;;  %v353_v12 = vrot.slane %v343_v8, %v338_v2  ;;  %v304_v13 = vrot.slane %v294_v9, %v293_v4  ;;  %v308_v14 = vrot.slane %v298_v10, %v293_v4  ;;  %597 = vmatprep.mubr.f32.mxu0 %v1080_v5 }
  0x72   : > { %vm526_vm13 = vcmask 1043456   ;;  %vm522_vm14 = vcmask 293888  }
  0x73   : > { %v356_v15 = vcombine.low %v349_v11, %v353_v12  ;;  %v311_v16 = vcombine.low %v304_v13, %v308_v14 }
  0x75   : > { %357 = vrot.lane.b32.xlu0 %v356_v15, %s1067_s24  ;;  %448 = vrot.lane.b32.xlu1 %v311_v16, %s1068_s26  ;;  %v313_v18 = vmul.f32 %v311_v16, %v1292_v17  ;;  %s810_s24 = sshll.u32 %s1133_s22, 7 }
  0x77   : > { %v315_v19 = vcombine.high %v313_v18, %v313_v18  ;;  %317 = vst [vmem:[#allocation2] sm:$0xf] %v313_v18 }
  0x79   : > { %318 = vst [vmem:[#allocation2 + $0x8] sm:$0xf] %v315_v19  ;;  %382 = vrot.lane.b32.xlu0 %v311_v16, %s1069_s9  ;;  %422 = vrot.lane.b32.xlu1 %v356_v15, %s1070_s10  ;;  %s1354_s10 = scalar_lea.hbm %s1403_s3, %s810_s24 }
  0x7d   : > { %486 = vrot.lane.b32.xlu0 %v356_v15, %s1071_s12  ;;  %325 = vrot.lane.b32.xlu1 %v1292_v17, %s1072_s13  ;;  %s647_s12 = sshll.u32 %s266_s16, 4  ;;  %s648_s12 = int_to_ptr.vmem [resolvable:$true] %s647_s12 }
  0x81   : > { %327 = vrot.lane.b32.xlu0 %v322_v21, %s1072_s13  ;;  %323 = vrot.lane.b32.xlu1 %v1303_v22, %s1072_s13  ;;  %s625_s13 = scalar_lea.sflag [#allocation5], %s1277_s28 }
  0x85   : > { %411 = vrot.lane.b32.xlu0 %v408_v23, %s1073_s29  ;;  %413 = vrot.lane.b32.xlu1 %v1296_v20, %s1073_s29 }
  0x89   : > { %475 = vrot.lane.b32.xlu0 %v1292_v17, %s1074_s30  ;;  %477 = vrot.lane.b32.xlu1 %v322_v21, %s1074_s30 }
  0x8d   : > { %409 = vrot.lane.b32.xlu0 %v1292_v17, %s1073_s29  ;;  %s992_s29 = scalar_lea.vmem %s648_s12, 128 }
  0x8e   : > { %p993_p2 = scmp.ne.s32.totalorder %s648_s12, %s992_s29 }
  0x90   : > { %p994_p1 = pnand %p993_p2, %p1231_p6 }
  0x92   : > { %p995_p4 = pneg %p994_p1 }
  0xe7   : > { %v358_v24 = vpop.permute.xlu0 %357  ;;  %v449_v25 = vpop.permute.xlu1 %448 }
  0xe8   : > { %v359_v26 = vrot.slane %v358_v24, 4  ;;  %v450_v27 = vrot.slane %v449_v25, 4 }
  0xea   : > { %v365_v28 = vmul.f32 %v359_v26, %v1296_v20  ;;  %v456_v29 = vmul.f32 %v450_v27, %v1296_v20  ;;  %v361_v30 = vsel %vm360_vm0, %v359_v26, %v358_v24  ;;  %v452_v44 = vsel %vm451_vm3, %v450_v27, %v449_v25 }
  0xeb   : > { %v383_v31 = vpop.permute.xlu0 %382  ;;  %v423_v32 = vpop.permute.xlu1 %422  ;;  %v364_v35 = vmul.f32 %v361_v30, %v1292_v17  ;;  %v455_v50 = vmul.f32 %v452_v44, %v1292_v17 }
  0xec   : > { %v384_v33 = vrot.slane %v383_v31, 4  ;;  %v424_v34 = vrot.slane %v423_v32, 4  ;;  %373 = vrot.lane.b32.xlu0 %v365_v28, %s1075_s23  ;;  %464 = vrot.lane.b32.xlu1 %v456_v29, %s1076_s27 }
  0xed   : > { %v368_v52 = vcombine.high %v364_v35, %v364_v35  ;;  %v459_v63 = vcombine.high %v455_v50, %v455_v50 }
  0xee   : > { %v386_v36 = vsel %vm385_vm1, %v384_v33, %v383_v31  ;;  %v430_v37 = vmul.f32 %v424_v34, %v1296_v20  ;;  %v426_v39 = vsel %vm425_vm2, %v424_v34, %v423_v32  ;;  %v390_v51 = vmul.f32 %v384_v33, %v1296_v20 }
  0xef   : > { %v389_v38 = vmul.f32 %v386_v36, %v1292_v17  ;;  %v487_v40 = vpop.permute.xlu0 %486  ;;  %v326_v41 = vpop.permute.xlu1 %325  ;;  %v429_v43 = vmul.f32 %v426_v39, %v1292_v17 }
  0xf0   : > { %369 = vrot.lane.b32.xlu0 %v364_v35, %s1075_s23  ;;  %v434_v42 = vcombine.low %v430_v37, %v430_v37  ;;  %v488_v49 = vrot.slane %v487_v40, 4  ;;  %v394_v57 = vcombine.low %v390_v51, %v390_v51 }
  0xf1   : > { %397 = vrot.lane.b32.xlu1 %v389_v38, %s1077_s8  ;;  %v393_v58 = vcombine.low %v389_v38, %v389_v38  ;;  %v433_v0 = vcombine.low %v429_v43, %v429_v43 }
  0xf2   : > { %v490_v56 = vsel %vm489_vm6, %v488_v49, %v487_v40  ;;  %v494_v4 = vmul.f32 %v488_v49, %v1296_v20 }
  0xf3   : > { %v328_v45 = vpop.permute.xlu0 %327  ;;  %v324_v46 = vpop.permute.xlu1 %323  ;;  %v493_v61 = vmul.f32 %v490_v56, %v1292_v17 }
  0xf4   : > { %437 = vrot.lane.b32.xlu0 %v429_v43, %s1078_s11  ;;  %v331_v47 = vsel %vm329_vm4, %v326_v41, %v328_v45  ;;  %v330_v48 = vsel %vm329_vm4, %v324_v46, %v326_v41  ;;  %v511_v46 = vld [vmem:[#allocation6] sm:$0xf] }
  0xf5   : > { %439 = vrot.lane.b32.xlu1 %v434_v42, %s1078_s11  ;;  %335 = vst [vmem:[#allocation2 + $0x8] sm:$0xf0] %v331_v47  ;;  %334 = vst [vmem:[#allocation2] sm:$0xf0] %v330_v48  ;;  %v497_v2 = vcombine.high %v493_v61, %v493_v61 }
  0xf7   : > { %v412_v53 = vpop.permute.xlu0 %411  ;;  %v414_v54 = vpop.permute.xlu1 %413 }
  0xf8   : > { %460 = vrot.lane.b32.xlu0 %v455_v50, %s1076_s27  ;;  %v417_v55 = vsel %vm415_vm5, %v412_v53, %v414_v54 }
  0xf9   : > { %371 = vrot.lane.b32.xlu1 %v368_v52, %s1075_s23  ;;  %421 = vst [vmem:[#allocation2 + $0x28] sm:$0xf] %v417_v55 }
  0xfb   : > { %v476_v59 = vpop.permute.xlu0 %475  ;;  %v478_v60 = vpop.permute.xlu1 %477 }
  0xfc   : > { %399 = vrot.lane.b32.xlu0 %v394_v57, %s1077_s8  ;;  %v481_v62 = vsel %vm479_vm7, %v476_v59, %v478_v60  ;;  %v513_v28 = vld [vmem:[#allocation2 + $0x8] sm:$0xff]  ;;  %v512_v32 = vld [vmem:[#allocation2] sm:$0xff] }
  0xfd   : > { %395 = vrot.lane.b32.xlu1 %v393_v58, %s1077_s8  ;;  %485 = vst [vmem:[#allocation2 + $0x38] sm:$0xf0] %v481_v62 }
  0xff   : > { %v410_v1 = vpop.permute.xlu0 %409 }
 0x100   : > { %462 = vrot.lane.b32.xlu0 %v459_v63, %s1076_s27  ;;  %v416_v3 = vsel %vm415_vm5, %v410_v1, %v412_v53 }
 0x101   : > { %435 = vrot.lane.b32.xlu1 %v433_v0, %s1078_s11  ;;  %420 = vst [vmem:[#allocation2 + $0x20] sm:$0xf] %v416_v3 }
 0x104   : > { %500 = vrot.lane.b32.xlu0 %v497_v2, %s1079_s14 }
 0x105   : > { %473 = vrot.lane.b32.xlu1 %v1303_v22, %s1074_s30  ;;  %s1081_s30 = smov [#allocation9]  }
 0x106   : > { %s996_s23 = sshll.u32 %s1081_s30, 4  ;;  %s997_s23 = int_to_ptr.vmem [resolvable:$false] %s996_s23 }
 0x107   : > { %s998_s27 = scalar_lea.vmem %s997_s23, 256  ;;  %p999_p8 = scmp.lt.s32.totalorder %s648_s12, %s997_s23 }
 0x108   : > { %498 = vrot.lane.b32.xlu0 %v493_v61, %s1079_s14  ;;  %p1000_p11 = scmp.lt.s32.totalorder %s998_s27, %s992_s29 }
 0x109   : > { %502 = vrot.lane.b32.xlu1 %v494_v4, %s1079_s14 }
 0x10a   : > { %p1001_p3 = por %p1000_p11, %p999_p8 }
 0x10c   : > { %p1002_p7 = pnand %p1001_p3, %p995_p4 }
 0x15e   : > { %v374_v6 = vpop.permute.xlu0 %373  ;;  %v465_v7 = vpop.permute.xlu1 %464 }
 0x162   : > { %v370_v8 = vpop.permute.xlu0 %369 }
 0x163   : > { %v398_v9 = vpop.permute.xlu1 %397 }
 0x166   : > { %v438_v10 = vpop.permute.xlu0 %437 }
 0x167   : > { %v440_v11 = vpop.permute.xlu1 %439 }
 0x168   : > { %v443_v12 = vsel %vm441_vm8, %v438_v10, %v440_v11 }
 0x169   : > { %447 = vst [vmem:[#allocation2 + $0x28] sm:$0xf0] %v443_v12 }
 0x16a   : > { %v461_v13 = vpop.permute.xlu0 %460 }
 0x16b   : > { %v372_v14 = vpop.permute.xlu1 %371 }
 0x16c   : > { %v376_v15 = vsel %vm375_vm9, %v370_v8, %v372_v14  ;;  %v377_v16 = vsel %vm375_vm9, %v372_v14, %v374_v6 }
 0x16d   : > { %380 = vst [vmem:[#allocation2 + $0x10] sm:$0xf] %v376_v15  ;;  %381 = vst [vmem:[#allocation2 + $0x18] sm:$0xf] %v377_v16 }
 0x16e   : > { %v400_v17 = vpop.permute.xlu0 %399 }
 0x16f   : > { %v403_v18 = vsel %vm401_vm10, %v398_v9, %v400_v17  ;;  %v396_v19 = vpop.permute.xlu1 %395 }
 0x170   : > { %407 = vst [vmem:[#allocation2 + $0x18] sm:$0xf0] %v403_v18  ;;  %v402_v20 = vsel %vm401_vm10, %v396_v19, %v398_v9  ;;  %v517_v38 = vld [vmem:[#allocation2 + $0x28] sm:$0xff] }
 0x171   : > { %406 = vst [vmem:[#allocation2 + $0x10] sm:$0xf0] %v402_v20 }
 0x172   : > { %v463_v21 = vpop.permute.xlu0 %462 }
 0x173   : > { %v467_v22 = vsel %vm466_vm11, %v461_v13, %v463_v21  ;;  %v468_v23 = vsel %vm466_vm11, %v463_v21, %v465_v7  ;;  %v436_v24 = vpop.permute.xlu1 %435 }
 0x174   : > { %471 = vst [vmem:[#allocation2 + $0x30] sm:$0xf] %v467_v22  ;;  %472 = vst [vmem:[#allocation2 + $0x38] sm:$0xf] %v468_v23  ;;  %v442_v25 = vsel %vm441_vm8, %v436_v24, %v438_v10 }
 0x175   : > { %446 = vst [vmem:[#allocation2 + $0x20] sm:$0xf0] %v442_v25 }
 0x176   : > { %v501_v26 = vpop.permute.xlu0 %500 }
 0x177   : > { %v474_v27 = vpop.permute.xlu1 %473  ;;  %v515_v29 = vld [vmem:[#allocation2 + $0x18] sm:$0xff] }
 0x178   : > { %v480_v30 = vsel %vm479_vm7, %v474_v27, %v476_v59  ;;  %v811_v31 = vpack.c.bf16 %v515_v29, %v513_v28  ;;  %v514_v33 = vld [vmem:[#allocation2 + $0x10] sm:$0xff] }
 0x179   : > { %484 = vst [vmem:[#allocation2 + $0x30] sm:$0xf0] %v480_v30  ;;  %v813_v34 = vpack.c.bf16 %v514_v33, %v512_v32 }
 0x17a   : > { %v499_v35 = vpop.permute.xlu0 %498  ;;  %812 = vmatprep.subr.bf16.mxu0 %v811_v31 }
 0x17b   : > { %v505_v36 = vsel %vm504_vm12, %v499_v35, %v501_v26  ;;  %v503_v37 = vpop.permute.xlu1 %502  ;;  %814 = vmatpush1.bf16.msra.mxu0 %v813_v34  ;;  %v519_v39 = vld [vmem:[#allocation2 + $0x38] sm:$0xff] }
 0x17c   : > { %509 = vst [vmem:[#allocation2 + $0x40] sm:$0xf] %v505_v36  ;;  %v506_v40 = vsel %vm504_vm12, %v501_v26, %v503_v37  ;;  %v815_v41 = vpack.c.bf16 %v519_v39, %v517_v38  ;;  %v516_v42 = vld [vmem:[#allocation2 + $0x20] sm:$0xff] }
 0x17d   : > { %510 = vst [vmem:[#allocation2 + $0x48] sm:$0xf] %v506_v40 }
 0x17e   : > { %816 = vmatprep.subr.bf16.mxu0 %v815_v41 }
 0x180   : > { %v518_v43 = vld [vmem:[#allocation2 + $0x30] sm:$0xff] }
 0x181   : > { %v817_v44 = vpack.c.bf16 %v518_v43, %v516_v42 }
 0x183   : > { %818 = vmatpush1.bf16.msra.mxu0 %v817_v44  ;;  %v520_v47 = vld [vmem:[#allocation2 + $0x40] sm:$0xf] }
 0x184   : > { %v521_v45 = vld [vmem:[#allocation2 + $0x48] sm:$0xf] }
 0x185   : > { %802 = vmatprep.subr.msk.mxu0 %vm526_vm13, %v521_v45 }
 0x187   : > { %803 = vmatpush1.msk.msra.mxu0 %vm526_vm13, %v520_v47 }
 0x188   : > { %804 = vmatmul.mubr.msk.f32.vlgmr.msra.gmra.mrb[0].mxu0 %vm522_vm14, %v511_v46 }
 0x25b   : > { %v599_v48 = vpop.f32.mrb[0].mxu0 }
 0x25c   : > { %v616_v49 = vmul.f32 %v599_v48, %v599_v48  ;;  %v601_v50 = vpop.f32.mrb[1].mxu0  ;;  %v609_v51 = vsel %vm526_vm13, %v599_v48, 0.0 }
 0x25d   : > { %v606_v52 = vcombine.low %v599_v48, %v601_v50  ;;  %v610_v53 = vsel %vm526_vm13, %v601_v50, 0.0  ;;  %v617_v54 = vmul.f32 %v601_v50, %v601_v50 }
 0x25e   : > { %v611_v55 = vadd.f32 %v610_v53, %v609_v51  ;;  %v618_v56 = vsel %vm526_vm13, %v616_v49, 0.0 }
 0x25f   : > { %v619_v57 = vsel %vm526_vm13, %v617_v54, 0.0  ;;  %608 = vst [vmem:[%s266_s16] sm:$0xff] %v606_v52 }
 0x260   : > { %612 = vadd.xlane.f32.xlu1 %v611_v55  ;;  %v620_v58 = vadd.f32 %v619_v57, %v618_v56 }
 0x262   : > { %621 = vadd.xlane.f32.xlu0 %v620_v58 }
 0x263   : > { %1005 = shalt.err (!%p1002_p7)
}
 0x264   : > { %s1006_s28 = scalar_lea.hbm %s1354_s10, 128  ;;  %s1010_s14 = scalar_lea.hbm %s1403_s3, 256 }
 0x265   : > { %p1007_p10 = scmp.ne.s32.totalorder %s1354_s10, %s1006_s28  ;;  %p1011_p0 = scmp.lt.u32.totalorder %s1354_s10, %s1403_s3 }
 0x266   : > { %p1012_p12 = scmp.lt.u32.totalorder %s1010_s14, %s1006_s28  ;;  %p1014_p2 = scmp.lt.u32.totalorder %s1006_s28, %s1354_s10 }
 0x267   : > { %p1008_p13 = pnand %p1007_p10, %p1231_p6 }
 0x268   : > { %p1013_p9 = por %p1012_p12, %p1011_p0 }
 0x269   : > { %p1009_p5 = pneg %p1008_p13 }
 0x26a   : > { %p1015_p1 = por %p1014_p2, %p1013_p9 }
 0x26c   : > { %p1016_p4 = pnand %p1015_p1, %p1009_p5 }
 0x26e   : > { %1019 = shalt.err (!%p1016_p4)
}
 0x26f   : > { %832 = dma.vmem_to_hbm [thread:$0]  (%p1231_p6), %s648_s12, 128, %s1354_s10, %s625_s13   ;;  %vm614_vm15 = vcmask 3072  }
 0x270   : > { %p279_p8 = scmp.lt.s32.totalorder %s1133_s22, 1 }
 0x272   : > { %s1427_s22 = smov (!%p279_p8, %s1133_s22), 1 }
 0x273   : > { %s800_s24 = sshll.u32 %s1427_s22, 2 }
 0x274   : > { %s282_s29 = scalar_lea.vmem %s1404_s4, %s800_s24  ;;  %s286_s27 = scalar_lea.vmem %s1405_s5, %s800_s24 }
 0x2ed   : > { %v613_v59 = vpop.xlane.xlu1 %612 }
 0x2ee   : > { %615 = vst.msk [vmem:[%s282_s29] sm:$0xf] %vm614_vm15, %v613_v59 }
 0x2ef   : > { %v622_v60 = vpop.xlane.xlu0 %621 }
 0x2f0   : > { %623 = vst.msk [vmem:[%s286_s27] sm:$0xf] %vm614_vm15, %v622_v60 }
 0x2f1 PF: > { %s665_s17 = sand.u32 1, %s1050_s18   ;;  %p1420_p6 = scmp.ne.s32.totalorder %s1410_s25, 0 }
 0x2f2   : > { %p1421_p11 = scmp.ge.s32.totalorder %s1062_s21, 2  ;;  %s666_s22 = scalar_lea.sflag [#allocation5], %s665_s17 }
 0x2f4   : > { %p846_p3 = pnand %p1421_p11, %p1420_p6 }
 0x2f6   : > { %1045 = dma.done.wait (!%p846_p3), %s666_s22, 128  }
 0x2f7   : > { %1047 = vsyncadd (!%p846_p3), %s666_s22, 4294967168  ;;  %p20_p7 = scmp.ge.s32.totalorder %s1168_s7, 4   ;;  %s1422_s18 = smov %s1054_s19 }
 0x2f8   : > { %s1423_s19 = smov %s1058_s20  ;;  %s1424_s20 = smov %s1227_s6 }
 0x2f9   : > { %s1425_s21 = smov %s1168_s7  ;;  %22 = sbr.rel (!%p20_p7) target bundleno = 6 (0x6), region = 109 }
 0x300   :  { %685 = vsyncpa [#allocation4], 1 }
 0x301   :  { %687 = vsyncpa [#allocation4 + $0x1], 1 }
 0x302   :  { %688 = vsyncpa [#allocation7], 1 }
 0x303   :  { %689 = vsyncpa [#allocation5], 1 }
 0x304   :  { %691 = vsyncpa [#allocation5 + $0x1], 1 }

</bundles_post_ra>
